<compile_context>
chip_gen: v5e
topology: v5e:2x2
jax: 0.10.0
libtpu: 0.0.40
codegen_flags: <defaults>
</compile_context>

<pallas_src>
import numpy as np
import jax
import jax.numpy as jnp
from jax.experimental import pallas as pl
from jax.experimental.pallas import tpu as pltpu


def _round_up(x, m):
    return ((x + m - 1) // m) * m


def make_cnn_kernel(is_att, kmax, dpack, c_pad, seq_len, dim, tb):
    """Fused TextCNN forward for one (tb, L, dim) batch tile."""

    def kernel(*refs):
        idx = 0
        x_ref = refs[idx]; idx += 1                      # (TB, L, dim)        bf16
        if is_att:
            att_w_ref = refs[idx]; idx += 1              # (1, dim)            f32
        convw_ref = refs[idx]; idx += 1                  # (kmax*dpack, Cpad)  bf16
        mask_ref = refs[idx]; idx += 1                   # (1, L, Cpad)        f32 additive
        bias_ref = refs[idx]; idx += 1                   # (1, Cpad)           f32
        fcw_ref = refs[idx]; idx += 1                    # (Cpad, NCpad)       bf16
        fcb_ref = refs[idx]; idx += 1                    # (1, NCpad)          f32
        out_ref = refs[idx]                              # (TB, NCpad)         f32

        x_bf = x_ref[...]

        # ---- attention: f32 elementwise, bf16 only at the MXU boundary ----
        if is_att:
            h = x_bf.astype(jnp.float32)
            m = jnp.tanh(h)
            w_att = att_w_ref[...].reshape(1, 1, dim)
            scores = jnp.sum(m * w_att, axis=-1, keepdims=True)        # (TB, L, 1)
            scores = scores - jnp.max(scores, axis=1, keepdims=True)
            e = jnp.exp(scores)
            denom = jnp.sum(e, axis=1, keepdims=True)
            a = e * pl.reciprocal(denom, approx=True)                  # softmax over time
            ha_bf = (h * a).astype(jnp.bfloat16)
            base = jnp.concatenate([ha_bf, x_bf], axis=-1)             # (TB, L, 2*dim) = [H*a, H]
        else:
            base = x_bf                                                # (TB, L, dim)

        # ---- im2col over time: kmax shifted copies along the feature axis --
        # Wrapped rows (t >= L - j) only ever feed output positions that the
        # per-branch additive mask kills (-1e30 sentinel; real conv outputs
        # never approach that magnitude).
        parts = [base]
        for j in range(1, kmax):
            parts.append(jnp.concatenate([base[:, j:, :], base[:, :j, :]], axis=1))
        lhs = jnp.concatenate(parts, axis=-1).reshape(tb * seq_len, kmax * dpack)

        # ONE MXU matmul: K = kmax*dpack fuses all taps, all conv branches and
        # both attention paths; tap accumulation happens inside the MXU.
        y = jnp.dot(lhs, convw_ref[...], preferred_element_type=jnp.float32)
        acc = y.reshape(tb, seq_len, c_pad) + mask_ref[...]            # validity mask
        pooled = jnp.max(acc, axis=1)                                  # (TB, Cpad)
        # relu(max(conv) + b) == max(relu(conv + b)) since bias is time-constant.
        feat = jnp.maximum(pooled + bias_ref[...], 0.0)
        # Dropout: identity (eval mode).

        # ---- fc + log_softmax (lane-dense; padded classes carry -1e30 bias) --
        logits = jnp.dot(feat.astype(jnp.bfloat16), fcw_ref[...],
                         preferred_element_type=jnp.float32) + fcb_ref[...]
        mx = jnp.max(logits, axis=-1, keepdims=True)
        lse = jnp.log(jnp.sum(jnp.exp(logits - mx), axis=-1, keepdims=True)) + mx
        out_ref[...] = logits - lse

    return kernel


def cnn_forward_pallas(tokens, params, kerl_sizes, is_att=True):
    kerl_sizes = tuple(int(k) for k in kerl_sizes)
    n_k = len(kerl_sizes)
    kmax = max(kerl_sizes)

    # Embedding gather is glue (data-dependent gather); done in plain JAX.
    emb_f32 = jnp.take(params["embed"], tokens, axis=0)               # (B, L, dim) f32
    B, L, dim = emb_f32.shape
    assert L >= kmax, "sequence length must be >= max kernel size"
    C = params["conv_w"][0].shape[-1]                                 # num_kerl
    num_class = params["fc_b"].shape[-1]
    dpack = 2 * dim if is_att else dim
    c_tot = n_k * C
    c_pad = _round_up(c_tot, 128)
    nc_pad = _round_up(num_class, 128)

    # ---- pack weights: im2col conv weight, additive time mask, bias, fc -----
    w_big = jnp.zeros((kmax * dpack, c_pad), jnp.float32)
    bias = jnp.zeros((1, c_pad), jnp.float32)
    mask = jnp.zeros((1, L, c_pad), jnp.float32)
    for ki, (k, cw, cb) in enumerate(zip(kerl_sizes, params["conv_w"], params["conv_b"])):
        col = ki * C
        for j in range(k):
            w_big = w_big.at[j * dpack:(j + 1) * dpack, col:col + C].set(cw[j])
        bias = bias.at[0, col:col + C].set(cb)
        mask = mask.at[0, L - k + 1:, col:col + C].set(-1e30)         # kill t >= L-k+1
    w_big = w_big.astype(jnp.bfloat16)

    fc_w = (jnp.zeros((c_pad, nc_pad), jnp.float32)
            .at[:c_tot, :num_class].set(params["fc_w"]).astype(jnp.bfloat16))
    fc_b = jnp.full((1, nc_pad), -1e30, jnp.float32).at[0, :num_class].set(params["fc_b"])

    if is_att:
        att_w = params["att_w"].reshape(1, dim).astype(jnp.float32)
        weights = [att_w, w_big, mask, bias, fc_w, fc_b]
    else:
        weights = [w_big, mask, bias, fc_w, fc_b]
    weight_bytes = sum(int(np.prod(w.shape)) * w.dtype.itemsize for w in weights)

    # ---- generation-aware batch tile / VMEM sizing --------------------------
    try:
        vmem_cap = int(pltpu.get_tpu_info().vmem_capacity_bytes)
    except Exception:
        vmem_cap = 128 * 2**20
    per_ex = (L * (dim * 2 * 2            # emb block, double-buffered bf16
                   + dpack * 2            # [H*a, H] base bf16
                   + kmax * dpack * 2     # im2col LHS bf16
                   + c_pad * 4            # conv output / acc f32
                   + 3 * dim * 4)         # attention f32 temporaries
              + nc_pad * 4 * 4)           # fc temporaries + output
    if B <= 8:
        tb = B
    else:
        budget = max(4 * 2**20, (2 * vmem_cap) // 3 - weight_bytes)
        tb = min(128, (B // 8) * 8)
        while tb > 8 and tb * per_ex > budget:
            tb -= 8
        # v7x megacore: prefer >= 2 grid steps so both TensorCores get work.
        if _round_up(B, tb) // tb < 2 and B >= 16:
            tb = max(8, ((tb // 2) // 8) * 8)
    b_pad = _round_up(B, tb)

    emb = emb_f32.astype(jnp.bfloat16)                                 # halve HBM->VMEM bytes
    if b_pad != B:
        emb = jnp.pad(emb, ((0, b_pad - B), (0, 0), (0, 0)))

    inputs = [emb]
    in_specs = [pl.BlockSpec((tb, L, dim), lambda i: (i, 0, 0))]
    if is_att:
        inputs.append(att_w)
        in_specs.append(pl.BlockSpec((1, dim), lambda i: (0, 0)))
    inputs += [w_big, mask, bias, fc_w, fc_b]
    in_specs += [
        pl.BlockSpec((kmax * dpack, c_pad), lambda i: (0, 0)),
        pl.BlockSpec((1, L, c_pad), lambda i: (0, 0, 0)),
        pl.BlockSpec((1, c_pad), lambda i: (0, 0)),
        pl.BlockSpec((c_pad, nc_pad), lambda i: (0, 0)),
        pl.BlockSpec((1, nc_pad), lambda i: (0, 0)),
    ]

    kernel = make_cnn_kernel(is_att, kmax, dpack, c_pad, L, dim, tb)

    need = weight_bytes + tb * per_ex
    vmem_limit = int(min((2 * vmem_cap) // 3, max(32 * 2**20, 2 * need)))

    flops = (2 * b_pad * L * (kmax * dpack) * c_pad                    # fused conv matmul
             + 2 * b_pad * c_pad * nc_pad                              # fc matmul
             + 6 * b_pad * L * dim)                                    # attention elementwise
    transcendentals = b_pad * L * (dim + 2) + b_pad * nc_pad           # tanh + exps
    bytes_accessed = (int(emb.size) * emb.dtype.itemsize + weight_bytes
                      + b_pad * nc_pad * 4)
    cost = pl.CostEstimate(flops=int(flops),
                           transcendentals=int(transcendentals),
                           bytes_accessed=int(bytes_accessed))

    out = pl.pallas_call(
        kernel,
        out_shape=jax.ShapeDtypeStruct((b_pad, nc_pad), jnp.float32),
        grid=(b_pad // tb,),
        in_specs=in_specs,
        out_specs=pl.BlockSpec((tb, nc_pad), lambda i: (i, 0)),
        compiler_params=pltpu.CompilerParams(
            dimension_semantics=("parallel",),
            vmem_limit_bytes=vmem_limit),
        cost_estimate=cost,
    )(*inputs)
    return out[:B, :num_class]


def cnn_forward_ref(tokens, params, kerl_sizes, is_att=True):
    """Pure-JAX f32 reference (mirrors the PyTorch forward) for validation."""
    H = jnp.take(params["embed"], tokens, axis=0)
    if is_att:
        M = jnp.tanh(H)
        scores = jnp.einsum("bld,d->bl", M, params["att_w"])
        a = jax.nn.softmax(scores, axis=1)[..., None]
        x = jnp.concatenate([H * a, H], axis=-1)
    else:
        x = H
    B, L, _ = x.shape
    pooled = []
    for w, b, k in zip(params["conv_w"], params["conv_b"], kerl_sizes):
        T = L - k + 1
        acc = jnp.zeros((B, T, w.shape[-1]), jnp.float32)
        for j in range(k):
            acc = acc + jnp.einsum("btd,dc->btc", x[:, j:j + T, :], w[j])
        conv = jax.nn.relu(acc + b[None, None, :])
        pooled.append(jnp.max(conv, axis=1))
    feat = jnp.concatenate(pooled, axis=-1)
    logits = feat @ params["fc_w"] + params["fc_b"]
    return jax.nn.log_softmax(logits, axis=1)


if __name__ == "__main__":
    # Small, deterministic config consistent with the module's __init__.
    num_word, dim, num_class = 50, 32, 4
    num_chan, num_kerl = 1, 8
    kerl_sizes = (3, 4, 5)
    is_att = True
    B, L = 2, 16
    D_conv = dim * 2 if is_att else dim

    key = jax.random.PRNGKey(0)
    k_emb, k_att, k_fc, k_fcb, k_tok, *k_convs = jax.random.split(key, 5 + 2 * len(kerl_sizes))

    params = {
        "embed": 0.1 * jax.random.normal(k_emb, (num_word, dim), jnp.float32),
        "att_w": 0.1 * jax.random.normal(k_att, (dim,), jnp.float32),
        "conv_w": [0.1 * jax.random.normal(k_convs[2 * i], (k, D_conv, num_kerl), jnp.float32)
                   for i, k in enumerate(kerl_sizes)],
        "conv_b": [0.1 * jax.random.normal(k_convs[2 * i + 1], (num_kerl,), jnp.float32)
                   for i, _ in enumerate(kerl_sizes)],
        "fc_w": 0.1 * jax.random.normal(k_fc, (num_kerl * len(kerl_sizes), num_class), jnp.float32),
        "fc_b": 0.1 * jax.random.normal(k_fcb, (num_class,), jnp.float32),
    }

    tokens = jax.random.randint(k_tok, (B, L), 0, num_word, dtype=jnp.int32)

    out = cnn_forward_pallas(tokens, params, kerl_sizes, is_att=is_att)
    out = jax.block_until_ready(out)

    ref = cnn_forward_ref(tokens, params, kerl_sizes, is_att=is_att)
    # bf16 MXU inputs => compare against the f32 reference with bf16 tolerance.
    np.testing.assert_allclose(np.asarray(out), np.asarray(ref), atol=2e-2, rtol=2e-2)
    assert out.shape == (B, num_class)

    print("KERNEL_OK")
</pallas_src>

<mosaic_0001>
module attributes {stable_mosaic.version = 11 : i64} {
  func.func @kernel(%arg0: i32, %arg1: memref<2x16x32xbf16, #tpu.memory_space<vmem>>, %arg2: memref<1x32xf32, #tpu.memory_space<vmem>>, %arg3: memref<320x128xbf16, #tpu.memory_space<vmem>>, %arg4: memref<1x16x128xf32, #tpu.memory_space<vmem>>, %arg5: memref<1x128xf32, #tpu.memory_space<vmem>>, %arg6: memref<128x128xbf16, #tpu.memory_space<vmem>>, %arg7: memref<1x128xf32, #tpu.memory_space<vmem>>, %arg8: memref<2x128xf32, #tpu.memory_space<vmem>>) attributes {dimension_semantics = [#tpu.dimension_semantics<parallel>], iteration_bounds = array<i64: 1>, scalar_prefetch = 0 : i64, scratch_operands = 0 : i64, tpu.core_type = #tpu.core_type<tc>, window_params = [{transform_indices = @transform_0, window_bounds = array<i64: 2, 16, 32>}, {pipeline_mode = #tpu.pipeline_mode<synchronous>, transform_indices = @transform_1, window_bounds = array<i64: 1, 32>}, {pipeline_mode = #tpu.pipeline_mode<synchronous>, transform_indices = @transform_2, window_bounds = array<i64: 320, 128>}, {pipeline_mode = #tpu.pipeline_mode<synchronous>, transform_indices = @transform_3, window_bounds = array<i64: 1, 16, 128>}, {pipeline_mode = #tpu.pipeline_mode<synchronous>, transform_indices = @transform_4, window_bounds = array<i64: 1, 128>}, {pipeline_mode = #tpu.pipeline_mode<synchronous>, transform_indices = @transform_5, window_bounds = array<i64: 128, 128>}, {pipeline_mode = #tpu.pipeline_mode<synchronous>, transform_indices = @transform_6, window_bounds = array<i64: 1, 128>}, {transform_indices = @transform_7, window_bounds = array<i64: 2, 128>}]} {
    %c0 = arith.constant 0 : index
    %c0_0 = arith.constant 0 : index
    %c0_1 = arith.constant 0 : index
    %0 = vector.load %arg1[%c0, %c0_0, %c0_1] : memref<2x16x32xbf16, #tpu.memory_space<vmem>>, vector<2x16x32xbf16>
    %1 = arith.extf %0 : vector<2x16x32xbf16> to vector<2x16x32xf32>
    %2 = math.tanh %1 : vector<2x16x32xf32>
    %c0_2 = arith.constant 0 : index
    %c0_3 = arith.constant 0 : index
    %3 = vector.load %arg2[%c0_2, %c0_3] : memref<1x32xf32, #tpu.memory_space<vmem>>, vector<1x32xf32>
    %4 = vector.shape_cast %3 : vector<1x32xf32> to vector<1x1x32xf32>
    %5 = vector.broadcast %4 : vector<1x1x32xf32> to vector<2x16x32xf32>
    %6 = arith.mulf %2, %5 : vector<2x16x32xf32>
    %cst = arith.constant dense<0.000000e+00> : vector<2x16xf32>
    %7 = vector.multi_reduction <add>, %6, %cst [2] : vector<2x16x32xf32> to vector<2x16xf32>
    %8 = vector.shape_cast %7 : vector<2x16xf32> to vector<2x16x1xf32>
    %cst_4 = arith.constant dense<0xFF800000> : vector<2x1xf32>
    %9 = vector.multi_reduction <maximumf>, %8, %cst_4 [1] : vector<2x16x1xf32> to vector<2x1xf32>
    %10 = vector.shape_cast %9 : vector<2x1xf32> to vector<2x1x1xf32>
    %11 = vector.broadcast %10 : vector<2x1x1xf32> to vector<2x16x1xf32>
    %12 = arith.subf %8, %11 : vector<2x16x1xf32>
    %13 = math.exp %12 : vector<2x16x1xf32>
    %cst_5 = arith.constant dense<0.000000e+00> : vector<2x1xf32>
    %14 = vector.multi_reduction <add>, %13, %cst_5 [1] : vector<2x16x1xf32> to vector<2x1xf32>
    %15 = vector.shape_cast %14 : vector<2x1xf32> to vector<2x1x1xf32>
    %16 = tpu.reciprocal %15 {approx = true} : vector<2x1x1xf32> -> vector<2x1x1xf32>
    %17 = vector.broadcast %16 : vector<2x1x1xf32> to vector<2x16x1xf32>
    %18 = arith.mulf %13, %17 : vector<2x16x1xf32>
    %19 = vector.broadcast %18 : vector<2x16x1xf32> to vector<2x16x32xf32>
    %20 = arith.mulf %1, %19 : vector<2x16x32xf32>
    %21 = arith.truncf %20 : vector<2x16x32xf32> to vector<2x16x32xbf16>
    %22 = tpu.concatenate %21, %0 in 2 : vector<2x16x32xbf16>, vector<2x16x32xbf16> -> vector<2x16x64xbf16>
    %23 = vector.extract_strided_slice %22 {offsets = [0, 1, 0], sizes = [2, 15, 64], strides = [1, 1, 1]} : vector<2x16x64xbf16> to vector<2x15x64xbf16>
    %24 = vector.extract_strided_slice %22 {offsets = [0, 0, 0], sizes = [2, 1, 64], strides = [1, 1, 1]} : vector<2x16x64xbf16> to vector<2x1x64xbf16>
    %25 = tpu.concatenate %23, %24 in 1 : vector<2x15x64xbf16>, vector<2x1x64xbf16> -> vector<2x16x64xbf16>
    %26 = vector.extract_strided_slice %22 {offsets = [0, 2, 0], sizes = [2, 14, 64], strides = [1, 1, 1]} : vector<2x16x64xbf16> to vector<2x14x64xbf16>
    %27 = vector.extract_strided_slice %22 {offsets = [0, 0, 0], sizes = [2, 2, 64], strides = [1, 1, 1]} : vector<2x16x64xbf16> to vector<2x2x64xbf16>
    %28 = tpu.concatenate %26, %27 in 1 : vector<2x14x64xbf16>, vector<2x2x64xbf16> -> vector<2x16x64xbf16>
    %29 = vector.extract_strided_slice %22 {offsets = [0, 3, 0], sizes = [2, 13, 64], strides = [1, 1, 1]} : vector<2x16x64xbf16> to vector<2x13x64xbf16>
    %30 = vector.extract_strided_slice %22 {offsets = [0, 0, 0], sizes = [2, 3, 64], strides = [1, 1, 1]} : vector<2x16x64xbf16> to vector<2x3x64xbf16>
    %31 = tpu.concatenate %29, %30 in 1 : vector<2x13x64xbf16>, vector<2x3x64xbf16> -> vector<2x16x64xbf16>
    %32 = vector.extract_strided_slice %22 {offsets = [0, 4, 0], sizes = [2, 12, 64], strides = [1, 1, 1]} : vector<2x16x64xbf16> to vector<2x12x64xbf16>
    %33 = vector.extract_strided_slice %22 {offsets = [0, 0, 0], sizes = [2, 4, 64], strides = [1, 1, 1]} : vector<2x16x64xbf16> to vector<2x4x64xbf16>
    %34 = tpu.concatenate %32, %33 in 1 : vector<2x12x64xbf16>, vector<2x4x64xbf16> -> vector<2x16x64xbf16>
    %35 = tpu.concatenate %22, %25, %28, %31, %34 in 2 : vector<2x16x64xbf16>, vector<2x16x64xbf16>, vector<2x16x64xbf16>, vector<2x16x64xbf16>, vector<2x16x64xbf16> -> vector<2x16x320xbf16>
    %36 = vector.shape_cast %35 : vector<2x16x320xbf16> to vector<32x320xbf16>
    %c0_6 = arith.constant 0 : index
    %c0_7 = arith.constant 0 : index
    %37 = vector.load %arg3[%c0_6, %c0_7] : memref<320x128xbf16, #tpu.memory_space<vmem>>, vector<320x128xbf16>
    %cst_8 = arith.constant dense<0.000000e+00> : vector<32x128xf32>
    %38 = tpu.matmul %36, %37, %cst_8 {dimension_numbers = #tpu.dot_dimension_numbers<[1], [0], [0], [1], [0, 0, 1, 1], [], []>} : vector<32x320xbf16>, vector<320x128xbf16>, vector<32x128xf32> -> vector<32x128xf32>
    %39 = vector.shape_cast %38 : vector<32x128xf32> to vector<2x16x128xf32>
    %c0_9 = arith.constant 0 : index
    %c0_10 = arith.constant 0 : index
    %c0_11 = arith.constant 0 : index
    %40 = vector.load %arg4[%c0_9, %c0_10, %c0_11] : memref<1x16x128xf32, #tpu.memory_space<vmem>>, vector<1x16x128xf32>
    %41 = vector.broadcast %40 : vector<1x16x128xf32> to vector<2x16x128xf32>
    %42 = arith.addf %39, %41 : vector<2x16x128xf32>
    %cst_12 = arith.constant dense<0xFF800000> : vector<2x128xf32>
    %43 = vector.multi_reduction <maximumf>, %42, %cst_12 [1] : vector<2x16x128xf32> to vector<2x128xf32>
    %c0_13 = arith.constant 0 : index
    %c0_14 = arith.constant 0 : index
    %44 = vector.load %arg5[%c0_13, %c0_14] : memref<1x128xf32, #tpu.memory_space<vmem>>, vector<1x128xf32>
    %45 = vector.broadcast %44 : vector<1x128xf32> to vector<2x128xf32>
    %46 = arith.addf %43, %45 : vector<2x128xf32>
    %cst_15 = arith.constant 0.000000e+00 : f32
    %47 = vector.broadcast %cst_15 : f32 to vector<2x128xf32>
    %48 = arith.maximumf %46, %47 : vector<2x128xf32>
    %49 = arith.truncf %48 : vector<2x128xf32> to vector<2x128xbf16>
    %c0_16 = arith.constant 0 : index
    %c0_17 = arith.constant 0 : index
    %50 = vector.load %arg6[%c0_16, %c0_17] : memref<128x128xbf16, #tpu.memory_space<vmem>>, vector<128x128xbf16>
    %cst_18 = arith.constant dense<0.000000e+00> : vector<2x128xf32>
    %51 = tpu.matmul %49, %50, %cst_18 {dimension_numbers = #tpu.dot_dimension_numbers<[1], [0], [0], [1], [0, 0, 1, 1], [], []>} : vector<2x128xbf16>, vector<128x128xbf16>, vector<2x128xf32> -> vector<2x128xf32>
    %c0_19 = arith.constant 0 : index
    %c0_20 = arith.constant 0 : index
    %52 = vector.load %arg7[%c0_19, %c0_20] : memref<1x128xf32, #tpu.memory_space<vmem>>, vector<1x128xf32>
    %53 = vector.broadcast %52 : vector<1x128xf32> to vector<2x128xf32>
    %54 = arith.addf %51, %53 : vector<2x128xf32>
    %cst_21 = arith.constant dense<0xFF800000> : vector<2xf32>
    %55 = vector.multi_reduction <maximumf>, %54, %cst_21 [1] : vector<2x128xf32> to vector<2xf32>
    %56 = vector.shape_cast %55 : vector<2xf32> to vector<2x1xf32>
    %57 = vector.broadcast %56 : vector<2x1xf32> to vector<2x128xf32>
    %58 = arith.subf %54, %57 : vector<2x128xf32>
    %59 = math.exp %58 : vector<2x128xf32>
    %cst_22 = arith.constant dense<0.000000e+00> : vector<2xf32>
    %60 = vector.multi_reduction <add>, %59, %cst_22 [1] : vector<2x128xf32> to vector<2xf32>
    %61 = vector.shape_cast %60 : vector<2xf32> to vector<2x1xf32>
    %62 = math.log %61 : vector<2x1xf32>
    %63 = arith.addf %62, %56 : vector<2x1xf32>
    %64 = vector.broadcast %63 : vector<2x1xf32> to vector<2x128xf32>
    %65 = arith.subf %54, %64 : vector<2x128xf32>
    %c0_23 = arith.constant 0 : index
    %c0_24 = arith.constant 0 : index
    %66 = vector.load %arg8[%c0_23, %c0_24] : memref<2x128xf32, #tpu.memory_space<vmem>>, vector<2x128xf32>
    tpu.vector_store %arg8[%c0_23, %c0_24], %65 {strides = array<i32>} : memref<2x128xf32, #tpu.memory_space<vmem>>, vector<2x128xf32>,
    return
  }
  func.func @transform_0(%arg0: i32) -> (i32, i32, i32) {
    %c0_i32 = arith.constant 0 : i32
    %c0_i32_0 = arith.constant 0 : i32
    %c0_i32_1 = arith.constant 0 : i32
    return %arg0, %c0_i32, %c0_i32_0 : i32, i32, i32
  }
  func.func @transform_1(%arg0: i32) -> (i32, i32) {
    %c0_i32 = arith.constant 0 : i32
    %c0_i32_0 = arith.constant 0 : i32
    %c0_i32_1 = arith.constant 0 : i32
    return %c0_i32, %c0_i32_0 : i32, i32
  }
  func.func @transform_2(%arg0: i32) -> (i32, i32) {
    %c0_i32 = arith.constant 0 : i32
    %c0_i32_0 = arith.constant 0 : i32
    %c0_i32_1 = arith.constant 0 : i32
    return %c0_i32, %c0_i32_0 : i32, i32
  }
  func.func @transform_3(%arg0: i32) -> (i32, i32, i32) {
    %c0_i32 = arith.constant 0 : i32
    %c0_i32_0 = arith.constant 0 : i32
    %c0_i32_1 = arith.constant 0 : i32
    %c0_i32_2 = arith.constant 0 : i32
    return %c0_i32, %c0_i32_0, %c0_i32_1 : i32, i32, i32
  }
  func.func @transform_4(%arg0: i32) -> (i32, i32) {
    %c0_i32 = arith.constant 0 : i32
    %c0_i32_0 = arith.constant 0 : i32
    %c0_i32_1 = arith.constant 0 : i32
    return %c0_i32, %c0_i32_0 : i32, i32
  }
  func.func @transform_5(%arg0: i32) -> (i32, i32) {
    %c0_i32 = arith.constant 0 : i32
    %c0_i32_0 = arith.constant 0 : i32
    %c0_i32_1 = arith.constant 0 : i32
    return %c0_i32, %c0_i32_0 : i32, i32
  }
  func.func @transform_6(%arg0: i32) -> (i32, i32) {
    %c0_i32 = arith.constant 0 : i32
    %c0_i32_0 = arith.constant 0 : i32
    %c0_i32_1 = arith.constant 0 : i32
    return %c0_i32, %c0_i32_0 : i32, i32
  }
  func.func @transform_7(%arg0: i32) -> (i32, i32) {
    %c0_i32 = arith.constant 0 : i32
    %c0_i32_0 = arith.constant 0 : i32
    return %arg0, %c0_i32 : i32, i32
  }
}

</mosaic_0001>

<bundles_post_ra>
// kernel: tpu_custom_call.1
= control target key start
LH: loop header
LB: loop body
LE: loop exit
PB: predicated region body
PF: predicated region fallthrough
CT: control target
= control target key end

     0   :  { %12 = vsyncpa [#allocation3], 0  ;;  %s1141_s0 = inlined_call_operand.hbm [shape: bf16[2,16,32], index: 0, kind: input, shape index: {}]   ;;  %s1142_s1 = inlined_call_operand.hbm [shape: f32[1,32], index: 1, kind: input, shape index: {}]   ;;  %s1143_s2 = inlined_call_operand.hbm [shape: bf16[320,128], index: 2, kind: input, shape index: {}]   ;;  %s1144_s3 = inlined_call_operand.hbm [shape: f32[1,16,128], index: 3, kind: input, shape index: {}]   ;;  %s1145_s4 = inlined_call_operand.vmem [shape: f32[1,128], index: 4, kind: input, shape index: {}]   ;;  %s1146_s5 = inlined_call_operand.hbm [shape: bf16[128,128], index: 5, kind: input, shape index: {}]   ;;  %s1147_s6 = inlined_call_operand.vmem [shape: f32[1,128], index: 6, kind: input, shape index: {}]   ;;  %s1148_s7 = inlined_call_operand.hbm [shape: f32[2,128], index: 7, kind: output, shape index: {}]  }
   0x1   :  { %13 = vsyncpa [#allocation6], 0 }
   0x2   :  { %14 = vsyncpa [#allocation9], 0  ;;  %s34_s26 = sshll.u32 %s1142_s1, 4  ;;  %s35_s26 = int_to_ptr.hbm [resolvable:$true] %s34_s26 }
   0x3   :  { %15 = vsyncpa [#allocation4], 0  ;;  %s1013_s27 = smov [#allocation5]   ;;  %s57_s8 = sshll.u32 %s1144_s3, 4  ;;  %s58_s8 = int_to_ptr.hbm [resolvable:$true] %s57_s8 }
   0x4   :  { %s36_s28 = sshll.u32 %s1013_s27, 4  ;;  %s1014_s9 = smov [#allocation8]   ;;  %s37_s28 = int_to_ptr.vmem [resolvable:$true] %s36_s28 }
   0x5   :  { %39 = dma.hbm_to_vmem [thread:$0]  %s35_s26, 16, %s37_s28, [#allocation6]  }
   0x6   :  { %s59_s10 = sshll.u32 %s1014_s9, 4  ;;  %s1015_s11 = smov 128   ;;  %s60_s10 = int_to_ptr.vmem [resolvable:$true] %s59_s10 }
   0x7   :  { %s1016_s12 = smov 8   ;;  %s20_s1 = sshll.u32 %s1141_s0, 4  ;;  %s21_s1 = int_to_ptr.hbm [resolvable:$true] %s20_s1 }
   0x8   :  { %65 = dma.hbm_to_vmem [thread:$0]  %s58_s8, 256, %s60_s10, [#allocation9], %s1015_s11, %s1015_s11, %s1016_s12  }
   0x9   :  { %s1017_s15 = smov [#allocation2]   ;;  %s44_s3 = sshll.u32 %s1143_s2, 4  ;;  %s45_s3 = int_to_ptr.hbm [resolvable:$true] %s44_s3 }
   0xa   :  { %s22_s16 = sshll.u32 %s1017_s15, 4  ;;  %s1018_s19 = smov 64   ;;  %s23_s16 = int_to_ptr.vmem [resolvable:$true] %s22_s16 }
   0xb   :  { %s1019_s20 = smov 4   ;;  %s1020_s21 = smov [#allocation7]  }
   0xc   :  { %28 = dma.hbm_to_vmem [thread:$0]  %s21_s1, 256, %s23_s16, [#allocation3], %s1018_s19, %s1018_s19, %s1019_s20  }
   0xd   :  { %s46_s22 = sshll.u32 %s1020_s21, 4  ;;  %s72_s0 = sshll.u32 %s1146_s5, 4  ;;  %s47_s22 = int_to_ptr.vmem [resolvable:$true] %s46_s22  ;;  %s73_s0 = int_to_ptr.hbm [resolvable:$true] %s72_s0 }
   0xe   :  { %52 = dma.hbm_to_vmem [thread:$0]  %s45_s3, 2560, %s47_s22, [#allocation6], %s1018_s19, %s1018_s19, %s1019_s20  }
   0xf   :  { %s1021_s25 = smov [#allocation10]  }
  0x10   :  { %s74_s26 = sshll.u32 %s1021_s25, 4  ;;  %s75_s26 = int_to_ptr.vmem [resolvable:$true] %s74_s26 }
  0x11   :  { %80 = dma.hbm_to_vmem [thread:$0]  %s73_s0, 1024, %s75_s26, [#allocation9], %s1018_s19, %s1018_s19, %s1019_s20  }
  0x12   :  { %1005 = dma.done.wait [#allocation3], 256  }
  0x13   :  { %1006 = vsyncadd [#allocation3], 4294967040 }
  0x14   :  { %1007 = dma.done.wait [#allocation6], 2576  }
  0x15   :  { %1008 = vsyncadd [#allocation6], 4294964720 }
  0x16   :  { %1009 = dma.done.wait [#allocation9], 1280  }
  0x17   :  { %1010 = vsyncadd [#allocation9], 4294966016  ;;  %v1085_v0 = vld [vmem:[#allocation2 + $0x8] sm:$0xff]   ;;  %v1088_v2 = vld [vmem:[#allocation2] sm:$0xff]   ;;  %s1022_s2 = smov 32   ;;  %vm124_vm0 = vcmask 261120  }
  0x18   :  { %v110_v1 = vunpack.c.l.bf16 %v1085_v0  ;;  %v111_v3 = vunpack.c.h.bf16 %v1085_v0  ;;  %v793_v4 = vld [vmem:[#allocation2] sm:$0xff]  ;;  %v108_v5 = vunpack.c.l.bf16 %v1088_v2  ;;  %v109_v6 = vunpack.c.h.bf16 %v1088_v2  ;;  %v834_v7 = vld [vmem:[#allocation5] ss:$0 sm:$0xff]  ;;  %v794_v8 = vld [vmem:[#allocation2 + $0x8] sm:$0xff]  ;;  %s659_s9 = sshll.u32 %s1148_s7, 4  ;;  %s660_s9 = int_to_ptr.hbm [resolvable:$true] %s659_s9 }
  0x19   :  { %211 = vrot.lane.b32.xlu2 %v793_v4, %s1022_s2  ;;  %v814_v39 = vld [vmem:[#allocation7 + $0x98] sm:$0xff]  ;;  %v813_v48 = vld [vmem:[#allocation7 + $0x90] sm:$0xff]  ;;  %v812_v49 = vld [vmem:[#allocation7 + $0x88] sm:$0xff]  ;;  %vm237_vm1 = vcmask 1047552   ;;  %vm238_vm2 = vsmask.f32 7424 }
  0x1a   :  { %837 = vtanh.f32 %v110_v1  ;;  %502 = vmatpush.bf16.msra.mxu2 %v814_v39  ;;  %v811_v52 = vld [vmem:[#allocation7 + $0x80] sm:$0xff]  ;;  %vm283_vm3 = vcmask 523264   ;;  %vm239_vm4 = vmand %vm237_vm1, %vm238_vm2  ;;  %vm572_vm5 = vcmask 1041409   ;;  %vm637_vm6 = vcmask 1041408  }
  0x1b   :  { %839 = vtanh.f32 %v108_v5 }
  0x1c   :  { %841 = vtanh.f32 %v111_v3 }
  0x1d   :  { %843 = vtanh.f32 %v109_v6 }
  0x1e   :  { %503 = vmatpush.bf16.msra.mxu2 %v813_v48 }
  0x20   :  { %v838_v9 = vpop.eup %837 }
  0x21   :  { %v840_v10 = vpop.eup %839  ;;  %v122_v11 = vmul.f32 %v838_v9, %v834_v7  ;;  %213 = vrot.lane.b32.xlu2 %v794_v8, %s1022_s2 }
  0x22   :  { %v842_v12 = vpop.eup %841  ;;  %v120_v13 = vmul.f32 %v840_v10, %v834_v7  ;;  %504 = vmatpush.bf16.msra.mxu2 %v812_v49 }
  0x23   :  { %v844_v14 = vpop.eup %843  ;;  %v131_v15 = vsel %vm124_vm0, %v122_v11, 0.0  ;;  %v123_v17 = vmul.f32 %v842_v12, %v834_v7 }
  0x24   :  { %132 = vadd.xlane.f32.xlu1 %v131_v15  ;;  %v125_v16 = vsel %vm124_vm0, %v120_v13, 0.0  ;;  %v121_v18 = vmul.f32 %v844_v14, %v834_v7  ;;  %v810_v13 = vld [vmem:[#allocation7 + $0x78] sm:$0xff] }
  0x25   :  { %126 = vadd.xlane.f32.xlu0 %v125_v16  ;;  %v134_v19 = vsel %vm124_vm0, %v123_v17, 0.0  ;;  %v802_v14 = vld [vmem:[#allocation7 + $0x38] sm:$0xff]  ;;  %479 = vmatpush.bf16.msra.mxu1 %v810_v13 }
  0x26   :  { %v128_v20 = vsel %vm124_vm0, %v121_v18, 0.0  ;;  %505 = vmatpush.bf16.msra.mxu2 %v811_v52  ;;  %460 = vmatpush.bf16.msra.mxu0 %v802_v14  ;;  %v809_v18 = vld [vmem:[#allocation7 + $0x70] sm:$0xff]  ;;  %v800_v52 = vld [vmem:[#allocation7 + $0x28] sm:$0xff] }
  0x29   :  { %480 = vmatpush.bf16.msra.mxu1 %v809_v18 }
  0x2c   :  { %135 = vadd.xlane.f32.xlu1 %v134_v19  ;;  %v801_v19 = vld [vmem:[#allocation7 + $0x30] sm:$0xff] }
  0x2d   :  { %129 = vadd.xlane.f32.xlu0 %v128_v20  ;;  %461 = vmatpush.bf16.msra.mxu0 %v801_v19 }
  0x31   :  { %462 = vmatpush.bf16.msra.mxu0 %v800_v52 }
  0x73   :  { %v212_v11 = vpop.permute.xlu2 %211 }
  0x97   :  { %v133_v21 = vpop.xlane.xlu1 %132 }
  0x98   :  { %v127_v22 = vpop.xlane.xlu0 %126 }
  0x9f   :  { %v136_v23 = vpop.xlane.xlu1 %135 }
  0xa0   :  { %v144_v24 = vmax.f32 %v133_v21, %v136_v23  ;;  %v130_v25 = vpop.xlane.xlu0 %129 }
  0xa1   :  { %v137_v26 = vmax.f32 %v127_v22, %v130_v25 }
  0xa2   :  { %v145_v27 = vrot.slane %v144_v24, 4 }
  0xa3   :  { %v138_v28 = vrot.slane %v137_v26, 4 }
  0xa4   :  { %v146_v29 = vmax.f32 %v144_v24, %v145_v27 }
  0xa5   :  { %v139_v30 = vmax.f32 %v137_v26, %v138_v28 }
  0xa6   :  { %v147_v31 = vrot.slane %v146_v29, 2 }
  0xa7   :  { %v140_v32 = vrot.slane %v139_v30, 2 }
  0xa8   :  { %v148_v33 = vmax.f32 %v146_v29, %v147_v31 }
  0xa9   :  { %v141_v34 = vmax.f32 %v139_v30, %v140_v32  ;;  %v214_v32 = vpop.permute.xlu2 %213 }
  0xaa   :  { %v149_v35 = vrot.slane %v148_v33, 1 }
  0xab   :  { %v142_v36 = vrot.slane %v141_v34, 1 }
  0xac   :  { %v150_v37 = vmax.f32 %v148_v33, %v149_v35 }
  0xad   :  { %v143_v38 = vmax.f32 %v141_v34, %v142_v36 }
  0xae   :  { %v153_v40 = vsub.f32 %v133_v21, %v150_v37  ;;  %v154_v41 = vsub.f32 %v136_v23, %v150_v37 }
  0xaf   :  { %v151_v42 = vsub.f32 %v127_v22, %v143_v38  ;;  %v152_v43 = vsub.f32 %v130_v25, %v143_v38 }
  0xb0   :  { %v159_v44 = vmul.f32 1.442695, %v153_v40  ;;  %v161_v45 = vmul.f32 1.442695, %v154_v41 }
  0xb1   :  { %v155_v46 = vmul.f32 1.442695, %v151_v42  ;;  %v157_v47 = vmul.f32 1.442695, %v152_v43 }
  0xb2   :  { %845 = vpow2.f32 %v159_v44 }
  0xb3   :  { %847 = vpow2.f32 %v161_v45 }
  0xb4   :  { %849 = vpow2.f32 %v155_v46 }
  0xb5   :  { %851 = vpow2.f32 %v157_v47 }
  0xb8   :  { %v846_v50 = vpop.eup %845 }
  0xb9   :  { %v848_v51 = vpop.eup %847 }
  0xba   :  { %v850_v53 = vpop.eup %849  ;;  %v170_v54 = vadd.f32 %v848_v51, %v846_v50 }
  0xbb   :  { %v852_v55 = vpop.eup %851 }
  0xbc   :  { %v171_v56 = vrot.slane %v170_v54, 4  ;;  %v163_v57 = vadd.f32 %v852_v55, %v850_v53 }
  0xbe   :  { %v172_v58 = vadd.f32 %v171_v56, %v170_v54  ;;  %v164_v59 = vrot.slane %v163_v57, 4  ;;  %v799_v54 = vld [vmem:[#allocation7 + $0x20] sm:$0xff]  ;;  %v798_v56 = vld [vmem:[#allocation7 + $0x18] sm:$0xff] }
  0xbf   :  { %463 = vmatpush.bf16.msra.mxu0 %v799_v54  ;;  %v835_v54 = vld [vmem:[%s1145_s4] ss:$0 sm:$0xff]  ;;  %s1023_s4 = smov [#allocation11]  }
  0xc0   :  { %v173_v60 = vrot.slane %v172_v58, 2  ;;  %v165_v61 = vadd.f32 %v164_v59, %v163_v57  ;;  %v805_v57 = vld [vmem:[#allocation7 + $0x50] sm:$0xff]  ;;  %v804_v59 = vld [vmem:[#allocation7 + $0x48] sm:$0xff]  ;;  %s657_s30 = sshll.u32 %s1023_s4, 4  ;;  %s658_s30 = int_to_ptr.vmem [resolvable:$true] %s657_s30 }
  0xc2   :  { %v174_v62 = vadd.f32 %v173_v60, %v172_v58  ;;  %v166_v63 = vrot.slane %v165_v61, 2  ;;  %v797_v58 = vld [vmem:[#allocation7 + $0x10] sm:$0xff]  ;;  %v796_v60 = vld [vmem:[#allocation7 + $0x8] sm:$0xff] }
  0xc3   :  { %464 = vmatpush.bf16.msra.mxu0 %v798_v56 }
  0xc4   :  { %v175_v4 = vrot.slane %v174_v62, 1  ;;  %v167_v7 = vadd.f32 %v166_v63, %v165_v61  ;;  %v803_v61 = vld [vmem:[#allocation7 + $0x40] sm:$0xff] }
  0xc6   :  { %v176_v8 = vadd.f32 %v175_v4, %v174_v62  ;;  %v168_v9 = vrot.slane %v167_v7, 1  ;;  %v795_v62 = vld [vmem:[#allocation7] sm:$0xff] }
  0xc7   :  { %465 = vmatpush.bf16.msra.mxu0 %v797_v58 }
  0xc8   :  { %853 = vrcp.f32 %v176_v8  ;;  %v169_v10 = vadd.f32 %v168_v9, %v167_v7 }
  0xca   :  { %855 = vrcp.f32 %v169_v10 }
  0xcb   :  { %466 = vmatpush.bf16.msra.mxu0 %v796_v60 }
  0xce   :  { %v854_v12 = vpop.eup %853 }
  0xcf   :  { %v182_v15 = vmul.f32 %v854_v12, %v848_v51  ;;  %v181_v16 = vmul.f32 %v854_v12, %v846_v50  ;;  %v808_v51 = vld [vmem:[#allocation7 + $0x68] sm:$0xff]  ;;  %467 = vmatpush.bf16.msra.mxu0 %v795_v62 }
  0xd0   :  { %v856_v17 = vpop.eup %855  ;;  %481 = vmatpush.bf16.msra.mxu1 %v808_v51 }
  0xd1   :  { %v180_v20 = vmul.f32 %v856_v17, %v852_v55  ;;  %v179_v21 = vmul.f32 %v856_v17, %v850_v53  ;;  %v185_v22 = vmul.f32 %v181_v16, %v110_v1  ;;  %v186_v23 = vmul.f32 %v182_v15, %v111_v3  ;;  %v807_v53 = vld [vmem:[#allocation7 + $0x60] sm:$0xff]  ;;  %v806_v55 = vld [vmem:[#allocation7 + $0x58] sm:$0xff]  ;;  %v822_v15 = vld [vmem:[#allocation10 + $0x38] sm:$0xff] }
  0xd2   :  { %624 = vmatpush.bf16.msra.mxu3 %v822_v15  ;;  %v821_v17 = vld [vmem:[#allocation10 + $0x30] sm:$0xff] }
  0xd3   :  { %v183_v24 = vmul.f32 %v179_v21, %v108_v5  ;;  %v184_v25 = vmul.f32 %v180_v20, %v109_v6  ;;  %v189_v26 = vpack.c.bf16 %v185_v22, %v185_v22  ;;  %v190_v27 = vpack.c.bf16 %v186_v23, %v186_v23  ;;  %v820_v20 = vld [vmem:[#allocation10 + $0x28] sm:$0xff]  ;;  %v819_v23 = vld [vmem:[#allocation10 + $0x20] sm:$0xff] }
  0xd4   :  { %482 = vmatpush.bf16.msra.mxu1 %v807_v53 }
  0xd5   :  { %v187_v28 = vpack.c.bf16 %v183_v24, %v183_v24  ;;  %v188_v29 = vpack.c.bf16 %v184_v25, %v184_v25  ;;  %v197_v30 = vunpack.c.l.b16 %v189_v26  ;;  %v198_v31 = vunpack.c.l.b16 %v190_v27  ;;  %v818_v26 = vld [vmem:[#allocation10 + $0x18] sm:$0xff] }
  0xd6   :  { %625 = vmatpush.bf16.msra.mxu3 %v821_v17 }
  0xd7   :  { %v195_v33 = vunpack.c.l.b16 %v187_v28  ;;  %v196_v1 = vunpack.c.l.b16 %v188_v29  ;;  %v200_v34 = vpack.c.b16 %v198_v31, %v197_v30  ;;  %v517_v29 = vld [vmem:[#allocation8] sm:$0xff]  ;;  %v518_v30 = vld [vmem:[#allocation8 + $0x8] sm:$0xff] }
  0xd8   :  { %483 = vmatpush.bf16.msra.mxu1 %v806_v55 }
  0xd9   :  { %v199_v0 = vpack.c.b16 %v196_v1, %v195_v33  ;;  %v1114_v3 = vsel %vm124_vm0, %v200_v34, %v214_v32  ;;  %v817_v32 = vld [vmem:[#allocation10 + $0x10] sm:$0xff] }
  0xda   :  { %v229_v5 = vshll.u32 %v1114_v3, 16  ;;  %v227_v6 = vshrl.u32 %v1114_v3, 16  ;;  %v265_v50 = vrot.slane %v1114_v3, 2  ;;  %v245_v12 = vrot.slane %v1114_v3, 1  ;;  %626 = vmatpush.bf16.msra.mxu3 %v820_v20 }
  0xdb   :  { %v217_v2 = vsel %vm124_vm0, %v199_v0, %v212_v11 }
  0xdc   :  { %v264_v35 = vrot.slane %v217_v2, 2  ;;  %v221_v36 = vshrl.u32 %v217_v2, 16  ;;  %v223_v37 = vshll.u32 %v217_v2, 16  ;;  %v231_v38 = vrot.slane %v229_v5, 1  ;;  %484 = vmatpush.bf16.msra.mxu1 %v805_v57 }
  0xdd   :  { %v254_v47 = vrot.slane %v227_v6, 1  ;;  %v255_v48 = vrot.slane %v229_v5, 2  ;;  %v244_v63 = vrot.slane %v217_v2, 1 }
  0xde   :  { %759 = vmatmul.msk.bf16.vlgmr.msra.gmra.mxu2 %vm283_vm3, %v264_v35  ;;  %v251_v39 = vrot.slane %v221_v36, 1  ;;  %v252_v40 = vrot.slane %v223_v37, 2  ;;  %v232_v41 = vor.u32 %v231_v38, %v227_v6  ;;  %v225_v42 = vrot.slane %v223_v37, 1  ;;  %627 = vmatpush.bf16.msra.mxu3 %v819_v23  ;;  %v815_v35 = vld [vmem:[#allocation10] sm:$0xff] }
  0xdf   :  { %v256_v49 = vor.u32 %v255_v48, %v254_v47 }
  0xe0   :  { %v253_v43 = vor.u32 %v252_v40, %v251_v39  ;;  %v241_v44 = vsel %vm239_vm4, %v232_v41, %v231_v38  ;;  %v226_v45 = vor.u32 %v225_v42, %v221_v36  ;;  %485 = vmatpush.bf16.msra.mxu1 %v804_v59 }
  0xe1   :  { %275 = vrot.lane.b32.xlu2 %v241_v44, %s1018_s19 }
  0xe2   :  { %279 = vrot.lane.b32.xlu1 %v253_v43, %s1018_s19  ;;  %v240_v46 = vsel %vm239_vm4, %v226_v45, %v225_v42  ;;  %628 = vmatpush.bf16.msra.mxu3 %v818_v26 }
  0xe3   :  { %273 = vrot.lane.b32.xlu0 %v240_v46, %s1018_s19 }
  0xe4   :  { %486 = vmatpush.bf16.msra.mxu1 %v803_v61 }
  0xe6   :  { %629 = vmatpush.bf16.msra.mxu3 %v817_v32 }
  0xe9   :  { %281 = vrot.lane.b32.xlu2 %v256_v49, %s1018_s19 }
  0xee   :  { %760 = vmatmul.msk.bf16.gmra.mxu2 %vm283_vm3, %v265_v50 }
 0x13b   :  { %v276_v10 = vpop.permute.xlu2 %275 }
 0x13c   :  { %v288_v14 = vsel %vm283_vm3, %v1114_v3, %v276_v10 }
 0x143   :  { %v282_v11 = vpop.permute.xlu2 %281 }
 0x144   :  { %v294_v13 = vsel %vm283_vm3, %v245_v12, %v282_v11  ;;  %v836_v11 = vld [vmem:[%s1147_s6] ss:$0 sm:$0xff] }
 0x154   :  { %v280_v4 = vpop.permute.xlu1 %279 }
 0x155   :  { %v274_v7 = vpop.permute.xlu0 %273  ;;  %v291_v8 = vsel %vm283_vm3, %v244_v63, %v280_v4 }
 0x156   :  { %487 = vmatmul.bf16.vlgmr.msra.gmra.mxu1 %v291_v8  ;;  %v285_v9 = vsel %vm283_vm3, %v217_v2, %v274_v7  ;;  %v816_v2 = vld [vmem:[#allocation10 + $0x8] sm:$0xff] }
 0x157   :  { %468 = vmatmul.bf16.vlgmr.msra.gmra.mxu0 %v285_v9  ;;  %630 = vmatpush.bf16.msra.mxu3 %v816_v2 }
 0x15b   :  { %631 = vmatpush.bf16.msra.mxu3 %v815_v35 }
 0x161   :  { %v507_v16 = vpop.f32.mrf.mxu2 }
 0x166   :  { %492 = vmatmul.bf16.gmra.mxu1 %v294_v13 }
 0x167   :  { %473 = vmatmul.bf16.gmra.mxu0 %v288_v14 }
 0x169   :  { %v509_v22 = vpop.f32.mrf.mxu2 }
 0x171   :  { %v512_v3 = vpop.f32.mrf.mxu2 }
 0x179   :  { %v514_v43 = vpop.f32.mrf.mxu2 }
 0x1d3   :  { %v488_v18 = vpop.f32.mrf.mxu1 }
 0x1d4   :  { %v469_v19 = vpop.f32.mrf.mxu0 }
 0x1d5   :  { %v489_v21 = vadd.f32 %v488_v18, %v469_v19 }
 0x1d7   :  { %v508_v27 = vadd.f32 %v507_v16, %v489_v21 }
 0x1d9   :  { %v519_v33 = vadd.f32 %v517_v29, %v508_v27 }
 0x1db   :  { %v490_v24 = vpop.f32.mrf.mxu1 }
 0x1dc   :  { %v471_v25 = vpop.f32.mrf.mxu0 }
 0x1dd   :  { %v491_v28 = vadd.f32 %v490_v24, %v471_v25 }
 0x1df   :  { %v510_v31 = vadd.f32 %v509_v22, %v491_v28 }
 0x1e1   :  { %v520_v1 = vadd.f32 %v518_v30, %v510_v31 }
 0x1e3   :  { %v523_v34 = vmax.f32 %v519_v33, %v520_v1  ;;  %v493_v0 = vpop.f32.mrf.mxu1 }
 0x1e4   :  { %v474_v5 = vpop.f32.mrf.mxu0 }
 0x1e5   :  { %v524_v6 = vrot.slane %v523_v34, 4  ;;  %v494_v37 = vadd.f32 %v493_v0, %v474_v5 }
 0x1e7   :  { %v525_v36 = vmax.f32 %v523_v34, %v524_v6  ;;  %v513_v41 = vadd.f32 %v512_v3, %v494_v37 }
 0x1e9   :  { %v526_v40 = vrot.slane %v525_v36, 2  ;;  %v521_v46 = vadd.f32 %v517_v29, %v513_v41 }
 0x1eb   :  { %v495_v38 = vpop.f32.mrf.mxu1  ;;  %v527_v45 = vmax.f32 %v525_v36, %v526_v40 }
 0x1ec   :  { %v476_v39 = vpop.f32.mrf.mxu0 }
 0x1ed   :  { %v496_v42 = vadd.f32 %v495_v38, %v476_v39  ;;  %v528_v50 = vrot.slane %v527_v45, 1 }
 0x1ef   :  { %v515_v44 = vadd.f32 %v514_v43, %v496_v42  ;;  %v529_v53 = vmax.f32 %v527_v45, %v528_v50 }
 0x1f1   :  { %v522_v47 = vadd.f32 %v518_v30, %v515_v44  ;;  %v541_v57 = vadd.f32 %v835_v54, %v529_v53 }
 0x1f3   :  { %v530_v48 = vmax.f32 %v521_v46, %v522_v47  ;;  %v543_v60 = vmax.f32 %v541_v57, 0.0 }
 0x1f5   :  { %v531_v49 = vrot.slane %v530_v48, 4  ;;  %v545_v62 = vpack.c.bf16 %v543_v60, %v543_v60 }
 0x1f7   :  { %v532_v51 = vmax.f32 %v530_v48, %v531_v49  ;;  %v569_v7 = vunpack.c.l.b16 %v545_v62 }
 0x1f9   :  { %v533_v52 = vrot.slane %v532_v51, 2 }
 0x1fb   :  { %v534_v55 = vmax.f32 %v532_v51, %v533_v52 }
 0x1fd   :  { %v535_v56 = vrot.slane %v534_v55, 1 }
 0x1ff   :  { %v536_v58 = vmax.f32 %v534_v55, %v535_v56 }
 0x201   :  { %v542_v59 = vadd.f32 %v835_v54, %v536_v58 }
 0x203   :  { %v544_v61 = vmax.f32 %v542_v59, 0.0 }
 0x205   :  { %v546_v63 = vpack.c.bf16 %v544_v61, %v544_v61 }
 0x207   :  { %v570_v4 = vunpack.c.l.b16 %v546_v63 }
 0x209   :  { %v571_v8 = vrot.slane %v570_v4, 7 }
 0x20b   :  { %v573_v9 = vsel %vm572_vm5, %v571_v8, %v569_v7 }
 0x20c   :  { %v574_v10 = vpack.c.b16 %v573_v9, %v573_v9 }
 0x20e   :  { %632 = vmatmul.bf16.vlgmr.msra.gmra.mxu3 %v574_v10 }
 0x291   :  { %v633_v12 = vpop.f32.mrf.mxu3 }
 0x292   :  { %v634_v13 = vadd.f32 %v836_v11, %v633_v12 }
 0x294   :  { %v638_v14 = vsel %vm637_vm6, %v634_v13, -inf }
 0x295   :  { %639 = vmax.xlane.f32.xlu2 %v638_v14 }
 0x299   :  { %v635_v15 = vpop.f32.mrf.mxu3 }
 0x308   :  { %v640_v16 = vpop.xlane.xlu2 %639 }
 0x309   :  { %v641_v17 = vsub.f32 %v634_v13, %v640_v16 }
 0x30b   :  { %v642_v18 = vmul.f32 1.442695, %v641_v17 }
 0x30d   :  { %857 = vpow2.f32 %v642_v18 }
 0x313   :  { %v858_v19 = vpop.eup %857 }
 0x314   :  { %v644_v20 = vsel %vm637_vm6, %v858_v19, 0.0 }
 0x315   :  { %645 = vadd.xlane.f32.xlu0 %v644_v20 }
 0x388   :  { %v646_v21 = vpop.xlane.xlu0 %645 }
 0x389   :  { %859 = vlog2.f32 %v646_v21 }
 0x38f   :  { %v860_v22 = vpop.eup %859 }
 0x390   :  { %v648_v23 = vmul.f32 0.6931472, %v860_v22 }
 0x392   :  { %v649_v24 = vadd.f32 %v648_v23, %v640_v16 }
 0x394   :  { %v650_v25 = vsub.f32 %v634_v13, %v649_v24 }
 0x396   :  { %651 = vst [vmem:[#allocation11] sm:$0x3] %v650_v25 }
 0x397   :  { %662 = dma.vmem_to_hbm [thread:$0]  %s658_s30, 32, %s660_s9, [#allocation4]  }
 0x398   :  { %1011 = dma.done.wait [#allocation4], 32  }
 0x399   :  { %1012 = vsyncadd [#allocation4], 4294967264 }
 0x39a   :  { %667 = vsyncpa [#allocation3], 1 }
 0x39b   :  { %668 = vsyncpa [#allocation6], 1 }
 0x39c   :  { %669 = vsyncpa [#allocation9], 1 }
 0x39d   :  { %670 = vsyncpa [#allocation4], 1 }

</bundles_post_ra>
